<compile_context>
chip_gen: v7x
topology: tpu7x:2x2x1
jax: 0.10.0
libtpu: 0.0.40
codegen_flags: <defaults>
</compile_context>

<pallas_src>
import functools

import jax
import jax.numpy as jnp
from jax.experimental import pallas as pl
from jax.experimental.pallas import tpu as pltpu


def _round_up(x, m):
    return ((x + m - 1) // m) * m


def _pick_tile(dim, target, align):
    """Pick a tile for `dim`: <= target, multiple of `align`, preferring a tile
    that divides `dim` exactly (so no wrapper-side padding of that axis).
    Returns (tile, padded_dim)."""
    if dim <= target:
        t = _round_up(dim, align)
        return t, t
    cand = (target // align) * align
    while cand >= align:
        if dim % cand == 0:
            return cand, dim          # exact divisor -> no padding needed
        cand -= align
    t = (target // align) * align     # no divisor found -> pad up to tile
    return t, _round_up(dim, t)


def _tpu_config():
    """Per-generation tile targets / VMEM budgets (falls back to safe defaults)."""
    kind = ""
    try:
        kind = jax.devices()[0].device_kind.lower()
    except Exception:
        pass
    if ("v5 lite" in kind) or ("v5e" in kind) or ("v5lite" in kind):
        # v5e: bf16 + 512x512 already hits the ~240 flop/B roofline.
        return dict(tm=512, tn=512, tk=1024,
                    gemm_vmem=64 << 20, cls_tile_bytes=16 << 20, cls_vmem=64 << 20)
    if ("v6" in kind) or ("trillium" in kind):
        # v6e: worst compute/BW ratio -> biggest tiles, plenty of 128 MiB VMEM.
        return dict(tm=1024, tn=2048, tk=1024,
                    gemm_vmem=96 << 20, cls_tile_bytes=16 << 20, cls_vmem=96 << 20)
    if "v7" in kind:
        # v7x: 64 MiB VMEM -> moderate tiles already reach the MXU roofline.
        return dict(tm=1024, tn=1024, tk=512,
                    gemm_vmem=40 << 20, cls_tile_bytes=8 << 20, cls_vmem=40 << 20)
    # unknown (v4/v5p/other): conservative middle ground.
    return dict(tm=512, tn=1024, tk=1024,
                gemm_vmem=64 << 20, cls_tile_bytes=16 << 20, cls_vmem=64 << 20)


# ------------------------- txt_res: tiled GEMM ------------------------------ #

def _txt_res_kernel(x_ref, w_ref, b_ref, o_ref, acc_ref):
    # x_ref: [tm, tk], w_ref: [tk, tn], b_ref: [1, tn], o_ref: [tm, tn]
    k = pl.program_id(2)

    @pl.when(k == 0)
    def _():
        acc_ref[...] = jnp.zeros_like(acc_ref)

    acc_ref[...] += jnp.dot(x_ref[...], w_ref[...],
                            preferred_element_type=jnp.float32)

    # bias + downcast only once, in the K-epilogue (keeps inner loop MXU-only)
    @pl.when(k == pl.num_programs(2) - 1)
    def _():
        o_ref[...] = (acc_ref[...] + b_ref[...].astype(jnp.float32)
                      ).astype(o_ref.dtype)


def _txt_res_matmul(x2d, w, b, out_dtype, cfg):
    """out[M, N] = x2d[M, K] @ w[K, N] + b[N] via a tiled, pipelined GEMM."""
    M, K = x2d.shape
    _, N = w.shape

    itemsize = jnp.dtype(x2d.dtype).itemsize
    align_m = 16 if itemsize < 4 else 8          # bf16 packs 16 rows / sublane pair

    tm, M_pad = _pick_tile(M, cfg["tm"], align_m)
    tn, N_pad = _pick_tile(N, cfg["tn"], 128)
    tk, K_pad = _pick_tile(K, cfg["tk"], 128)

    # Padding only happens for small / ragged shapes; for 128-aligned D/V the
    # big [K, V] weight and [M, V] output are used as-is (no extra HBM copies).
    if (M_pad != M) or (K_pad != K):
        x2d = jnp.pad(x2d, ((0, M_pad - M), (0, K_pad - K)))
    if (K_pad != K) or (N_pad != N):
        w = jnp.pad(w, ((0, K_pad - K), (0, N_pad - N)))
    b2d = b.reshape(1, N)
    if N_pad != N:
        b2d = jnp.pad(b2d, ((0, 0), (0, N_pad - N)))

    grid = (M_pad // tm, N_pad // tn, K_pad // tk)

    # TODO(synk): if profiling shows exposed DMA latency on the w stream, add
    # pipeline_mode=pl.Buffered(3) to the w BlockSpec only.
    out = pl.pallas_call(
        _txt_res_kernel,
        out_shape=jax.ShapeDtypeStruct((M_pad, N_pad), out_dtype),
        grid_spec=pltpu.PrefetchScalarGridSpec(
            num_scalar_prefetch=0,
            grid=grid,
            in_specs=[
                pl.BlockSpec((tm, tk), lambda i, j, k: (i, k)),
                pl.BlockSpec((tk, tn), lambda i, j, k: (k, j)),
                pl.BlockSpec((1, tn), lambda i, j, k: (0, j)),
            ],
            out_specs=pl.BlockSpec((tm, tn), lambda i, j, k: (i, j)),
            scratch_shapes=[pltpu.VMEM((tm, tn), jnp.float32)],
        ),
        compiler_params=pltpu.CompilerParams(
            dimension_semantics=("parallel", "parallel", "arbitrary"),
            vmem_limit_bytes=cfg["gemm_vmem"],
        ),
    )(x2d, w, b2d)

    if (M_pad != M) or (N_pad != N):
        out = out[:M, :N]
    return out


# --------------------- txt_cls: streaming mean + linear --------------------- #

def _txt_cls_kernel(x_ref, w_ref, b_ref, o_ref, acc_ref, *, inv_seq_len):
    # x_ref: [tb, ts, D], w_ref: [D, C], b_ref: [1, C], o_ref: [tb, C]
    s = pl.program_id(1)

    @pl.when(s == 0)
    def _():
        acc_ref[...] = jnp.zeros_like(acc_ref)

    # accumulate per-batch partial sums in f32 (input may stream in bf16)
    acc_ref[...] += jnp.sum(x_ref[...].astype(jnp.float32), axis=1)

    @pl.when(s == pl.num_programs(1) - 1)
    def _():
        seq_repr = acc_ref[...] * inv_seq_len                      # [tb, D]
        out = jnp.dot(seq_repr, w_ref[...].astype(jnp.float32),
                      preferred_element_type=jnp.float32)          # [tb, C]
        o_ref[...] = (out + b_ref[...].astype(jnp.float32)).astype(o_ref.dtype)


def _txt_cls_head(x, w, b, out_dtype, cfg):
    B, S, D = x.shape
    C = w.shape[1]
    itemsize = jnp.dtype(x.dtype).itemsize

    # Batch tile: keep small batches whole, otherwise tile in multiples of 8 so
    # the batch grid axis can run "parallel" (megacore) and acc stays bounded.
    if B <= 8:
        tb, B_pad = B, B
    else:
        tb, B_pad = _pick_tile(B, 64, 8)

    # Seq tile sized so one double-buffered input tile fits the per-gen budget.
    max_rows = max(8, cfg["cls_tile_bytes"] // (2 * max(tb, 1) * max(D, 1) * itemsize))
    ts = max(8, min(_round_up(S, 8), (max_rows // 8) * 8))
    S_pad = _round_up(S, ts)

    pad_b, pad_s = B_pad - B, S_pad - S
    x_p = jnp.pad(x, ((0, pad_b), (0, pad_s), (0, 0))) if (pad_b or pad_s) else x
    b2d = b.reshape(1, C)

    kernel = functools.partial(_txt_cls_kernel, inv_seq_len=1.0 / S)

    # TODO(synk): output last dim is C=2 -> tiny masked store; negligible (B*C elems).
    out = pl.pallas_call(
        kernel,
        out_shape=jax.ShapeDtypeStruct((B_pad, C), out_dtype),
        grid_spec=pltpu.PrefetchScalarGridSpec(
            num_scalar_prefetch=0,
            grid=(B_pad // tb, S_pad // ts),
            in_specs=[
                pl.BlockSpec((tb, ts, D), lambda bi, si: (bi, si, 0)),
                pl.BlockSpec((D, C), lambda bi, si: (0, 0)),
                pl.BlockSpec((1, C), lambda bi, si: (0, 0)),
            ],
            out_specs=pl.BlockSpec((tb, C), lambda bi, si: (bi, 0)),
            scratch_shapes=[pltpu.VMEM((tb, D), jnp.float32)],
        ),
        compiler_params=pltpu.CompilerParams(
            dimension_semantics=("parallel", "arbitrary"),
            vmem_limit_bytes=cfg["cls_vmem"],
        ),
    )(x_p, w, b2d)

    if B_pad != B:
        out = out[:B]
    return out


# ----------------------------- public wrapper ------------------------------- #

@functools.partial(jax.jit,
                   static_argnames=("task_id", "compute_dtype", "out_dtype"))
def multi_task_head(x, params, *, task_id,
                    compute_dtype=jnp.bfloat16, out_dtype=None):
    """Pallas implementation of MultiTaskHead.forward (task_id is static).

    compute_dtype controls the streaming dtype of activations/weights at the
    kernel boundary (default bf16; f32 accumulation is always kept inside the
    kernels).  out_dtype defaults to x.dtype; pass jnp.bfloat16 to also halve
    the logits writeback.
    """
    B, S, D = x.shape
    odt = x.dtype if out_dtype is None else out_dtype
    cfg = _tpu_config()

    if task_id == 1:
        w, b = params["txt_res_w"], params["txt_res_b"]    # [D, V], [V]
        V = w.shape[1]
        x2d = x.reshape(B * S, D)
        if compute_dtype is not None:
            x2d = x2d.astype(compute_dtype)
            w = w.astype(compute_dtype)
        out2d = _txt_res_matmul(x2d, w, b, odt, cfg)
        return out2d.reshape(B, S, V)

    elif task_id == 0:
        w, b = params["txt_cls_w"], params["txt_cls_b"]    # [D, 2], [2]
        xc = x.astype(compute_dtype) if compute_dtype is not None else x
        return _txt_cls_head(xc, w, b, odt, cfg)

    else:
        raise ValueError(f"Unknown task_id: {task_id}")


# ----------------------------- params init ---------------------------------- #

def init_params(key, input_dim, vocab_size):
    """Deterministic init mirroring nn.Linear's U(-1/sqrt(fan_in), 1/sqrt(fan_in))."""
    k1, k2, k3, k4 = jax.random.split(key, 4)
    bound = 1.0 / jnp.sqrt(jnp.float32(input_dim))
    return {
        # stored as [in, out] so the kernel does x @ W (PyTorch stores [out, in])
        "txt_cls_w": jax.random.uniform(k1, (input_dim, 2), jnp.float32,
                                        -bound, bound),
        "txt_cls_b": jax.random.uniform(k2, (2,), jnp.float32, -bound, bound),
        "txt_res_w": jax.random.uniform(k3, (input_dim, vocab_size),
                                        jnp.float32, -bound, bound),
        "txt_res_b": jax.random.uniform(k4, (vocab_size,), jnp.float32,
                                        -bound, bound),
    }


# ----------------------------- main ------------------------------------------ #

if __name__ == "__main__":
    B, S, D, V = 2, 8, 32, 16

    key = jax.random.PRNGKey(0)
    kx, kp = jax.random.split(key)
    x = jax.random.normal(kx, (B, S, D), jnp.float32)
    params = init_params(kp, input_dim=D, vocab_size=V)

    # reference in plain JAX
    ref_res = jnp.einsum("bsd,dv->bsv", x, params["txt_res_w"]) + params["txt_res_b"]
    ref_cls = x.mean(axis=1) @ params["txt_cls_w"] + params["txt_cls_b"]

    # exact f32-compute path (tight tolerance)
    out_res_f32 = multi_task_head(x, params, task_id=1, compute_dtype=jnp.float32)
    out_cls_f32 = multi_task_head(x, params, task_id=0, compute_dtype=jnp.float32)
    jax.block_until_ready((out_res_f32, out_cls_f32))
    assert out_res_f32.shape == (B, S, V) and out_cls_f32.shape == (B, 2)
    assert jnp.allclose(out_res_f32, ref_res, atol=1e-5)
    assert jnp.allclose(out_cls_f32, ref_cls, atol=1e-5)

    # default bf16-streaming path (f32 accumulation inside kernels)
    out_res = multi_task_head(x, params, task_id=1)
    out_cls = multi_task_head(x, params, task_id=0)
    jax.block_until_ready((out_res, out_cls))
    assert out_res.shape == (B, S, V) and out_cls.shape == (B, 2)
    assert jnp.allclose(out_res, ref_res, atol=1e-1, rtol=1e-1)
    assert jnp.allclose(out_cls, ref_cls, atol=1e-1, rtol=1e-1)

    print("KERNEL_OK")
</pallas_src>

<mosaic_0001>
module attributes {stable_mosaic.version = 11 : i64} {
  func.func @_txt_res_kernel(%arg0: i32, %arg1: i32, %arg2: i32, %arg3: memref<16x128xf32, #tpu.memory_space<vmem>>, %arg4: memref<128x128xf32, #tpu.memory_space<vmem>>, %arg5: memref<1x128xf32, #tpu.memory_space<vmem>>, %arg6: memref<16x128xf32, #tpu.memory_space<vmem>>, %arg7: memref<16x128xf32, #tpu.memory_space<vmem>>) attributes {dimension_semantics = [#tpu.dimension_semantics<parallel>, #tpu.dimension_semantics<parallel>, #tpu.dimension_semantics<arbitrary>], iteration_bounds = array<i64: 1, 1, 1>, scalar_prefetch = 0 : i64, scratch_operands = 1 : i64, tpu.core_type = #tpu.core_type<tc>, window_params = [{transform_indices = @transform_0, window_bounds = array<i64: 16, 128>}, {transform_indices = @transform_1, window_bounds = array<i64: 128, 128>}, {transform_indices = @transform_2, window_bounds = array<i64: 1, 128>}, {transform_indices = @transform_3, window_bounds = array<i64: 16, 128>}]} {
    %c0_i32 = arith.constant 0 : i32
    %0 = arith.cmpi eq, %arg2, %c0_i32 : i32
    %1 = arith.extui %0 : i1 to i32
    %c0_i32_0 = arith.constant 0 : i32
    %2 = arith.cmpi ne, %1, %c0_i32_0 : i32
    scf.if %2 {
      %cst_10 = arith.constant 0.000000e+00 : f32
      %12 = vector.broadcast %cst_10 : f32 to vector<16x128xf32>
      %c0_11 = arith.constant 0 : index
      %c0_12 = arith.constant 0 : index
      %13 = vector.load %arg7[%c0_11, %c0_12] : memref<16x128xf32, #tpu.memory_space<vmem>>, vector<16x128xf32>
      tpu.vector_store %arg7[%c0_11, %c0_12], %12 {strides = array<i32>} : memref<16x128xf32, #tpu.memory_space<vmem>>, vector<16x128xf32>,
    } else {
    }
    %c0 = arith.constant 0 : index
    %c0_1 = arith.constant 0 : index
    %3 = vector.load %arg7[%c0, %c0_1] : memref<16x128xf32, #tpu.memory_space<vmem>>, vector<16x128xf32>
    %c0_2 = arith.constant 0 : index
    %c0_3 = arith.constant 0 : index
    %4 = vector.load %arg3[%c0_2, %c0_3] : memref<16x128xf32, #tpu.memory_space<vmem>>, vector<16x128xf32>
    %c0_4 = arith.constant 0 : index
    %c0_5 = arith.constant 0 : index
    %5 = vector.load %arg4[%c0_4, %c0_5] : memref<128x128xf32, #tpu.memory_space<vmem>>, vector<128x128xf32>
    %cst = arith.constant dense<0.000000e+00> : vector<16x128xf32>
    %6 = tpu.matmul %4, %5, %cst {dimension_numbers = #tpu.dot_dimension_numbers<[1], [0], [0], [1], [0, 0, 1, 1], [], []>} : vector<16x128xf32>, vector<128x128xf32>, vector<16x128xf32> -> vector<16x128xf32>
    %7 = arith.addf %3, %6 : vector<16x128xf32>
    %c0_6 = arith.constant 0 : index
    %c0_7 = arith.constant 0 : index
    %8 = vector.load %arg7[%c0_6, %c0_7] : memref<16x128xf32, #tpu.memory_space<vmem>>, vector<16x128xf32>
    tpu.vector_store %arg7[%c0_6, %c0_7], %7 {strides = array<i32>} : memref<16x128xf32, #tpu.memory_space<vmem>>, vector<16x128xf32>,
    %c0_i32_8 = arith.constant 0 : i32
    %9 = arith.cmpi eq, %arg2, %c0_i32_8 : i32
    %10 = arith.extui %9 : i1 to i32
    %c0_i32_9 = arith.constant 0 : i32
    %11 = arith.cmpi ne, %10, %c0_i32_9 : i32
    scf.if %11 {
      %c0_10 = arith.constant 0 : index
      %c0_11 = arith.constant 0 : index
      %12 = vector.load %arg7[%c0_10, %c0_11] : memref<16x128xf32, #tpu.memory_space<vmem>>, vector<16x128xf32>
      %c0_12 = arith.constant 0 : index
      %c0_13 = arith.constant 0 : index
      %13 = vector.load %arg5[%c0_12, %c0_13] : memref<1x128xf32, #tpu.memory_space<vmem>>, vector<1x128xf32>
      %14 = vector.broadcast %13 : vector<1x128xf32> to vector<16x128xf32>
      %15 = arith.addf %12, %14 : vector<16x128xf32>
      %c0_14 = arith.constant 0 : index
      %c0_15 = arith.constant 0 : index
      %16 = vector.load %arg6[%c0_14, %c0_15] : memref<16x128xf32, #tpu.memory_space<vmem>>, vector<16x128xf32>
      tpu.vector_store %arg6[%c0_14, %c0_15], %15 {strides = array<i32>} : memref<16x128xf32, #tpu.memory_space<vmem>>, vector<16x128xf32>,
    } else {
    }
    return
  }
  func.func @transform_0(%arg0: i32, %arg1: i32, %arg2: i32) -> (i32, i32) {
    %c0_i32 = arith.constant 0 : i32
    return %arg0, %arg2 : i32, i32
  }
  func.func @transform_1(%arg0: i32, %arg1: i32, %arg2: i32) -> (i32, i32) {
    %c0_i32 = arith.constant 0 : i32
    return %arg2, %arg1 : i32, i32
  }
  func.func @transform_2(%arg0: i32, %arg1: i32, %arg2: i32) -> (i32, i32) {
    %c0_i32 = arith.constant 0 : i32
    %c0_i32_0 = arith.constant 0 : i32
    return %c0_i32, %arg1 : i32, i32
  }
  func.func @transform_3(%arg0: i32, %arg1: i32, %arg2: i32) -> (i32, i32) {
    %c0_i32 = arith.constant 0 : i32
    return %arg0, %arg1 : i32, i32
  }
}

</mosaic_0001>

<bundles_post_ra>
// kernel: multi_task_head.1
= control target key start
LH: loop header
LB: loop body
LE: loop exit
PB: predicated region body
PF: predicated region fallthrough
CT: control target
= control target key end

     0   :  { %8 = vsyncpa [#allocation4], 0  ;;  %s469_s0 = inlined_call_operand.hbm [shape: f32[16,128], index: 0, kind: input, shape index: {}]   ;;  %s470_s1 = inlined_call_operand.hbm [shape: f32[128,128], index: 1, kind: input, shape index: {}]   ;;  %s471_s2 = inlined_call_operand.hbm [shape: f32[1,128], index: 2, kind: input, shape index: {}]   ;;  %s472_s3 = inlined_call_operand.hbm [shape: f32[16,128], index: 3, kind: output, shape index: {}]  }
   0x1   :  { %9 = vsyncpa [#allocation7], 0 }
   0x2   :  { %10 = vsyncpa [#allocation5], 0  ;;  %s379_s12 = smov [#allocation6]   ;;  %s380_s14 = smov [#allocation3]  }
   0x3   :  { %s28_s13 = sshll.u32 %s379_s12, 4  ;;  %s16_s15 = sshll.u32 %s380_s14, 4  ;;  %s29_s13 = int_to_ptr.vmem [resolvable:$true] %s28_s13  ;;  %s405_s15 = int_to_ptr.vmem [resolvable:$true] %s16_s15 }
   0x4   :  { %s285_s18 = scalar_lea.hbm %s470_s1, 2048 }
   0x5   :  { %p286_p0 = scmp.ne.s32.totalorder %s470_s1, %s285_s18  ;;  %p289_p1 = scmp.lt.u32.totalorder %s285_s18, %s470_s1 }
   0x7   :  { %p291_p2 = pnand %p289_p1, %p286_p0 }
   0x9   :  { %294 = shalt.err (!%p291_p2)
}
   0xa   :  { %s295_s23 = scalar_lea.vmem %s29_s13, 2048  ;;  %p300_p4 = scmp.lt.s32.totalorder %s29_s13, %s29_s13 }
   0xb   :  { %p296_p3 = scmp.ne.s32.totalorder %s29_s13, %s295_s23  ;;  %p301_p5 = scmp.lt.s32.totalorder %s295_s23, %s295_s23 }
   0xd   :  { %p302_p6 = por %p301_p5, %p300_p4 }
   0xf   :  { %p303_p7 = pnand %p302_p6, %p296_p3 }
  0x11   :  { %306 = shalt.err (!%p303_p7)
}
  0x12   :  { %s381_s24 = smov 128   ;;  %s382_s25 = smov 8  }
  0x13   :  { %34 = dma.hbm_to_vmem [thread:$0]  %s470_s1, 2048, %s29_s13, [#allocation7], %s381_s24, %s381_s24, %s382_s25  }
  0x14   :  { %s307_s30 = scalar_lea.hbm %s469_s0, 256 }
  0x15   :  { %p308_p8 = scmp.ne.s32.totalorder %s469_s0, %s307_s30  ;;  %p311_p9 = scmp.lt.u32.totalorder %s307_s30, %s469_s0 }
  0x17   :  { %p313_p10 = pnand %p311_p9, %p308_p8 }
  0x19   :  { %316 = shalt.err (!%p313_p10)
}
  0x1a   :  { %s317_s8 = scalar_lea.vmem %s405_s15, 256  ;;  %p322_p12 = scmp.lt.s32.totalorder %s405_s15, %s405_s15 }
  0x1b   :  { %p318_p11 = scmp.ne.s32.totalorder %s405_s15, %s317_s8  ;;  %p323_p13 = scmp.lt.s32.totalorder %s317_s8, %s317_s8 }
  0x1d   :  { %p324_p0 = por %p323_p13, %p322_p12 }
  0x1f   :  { %p325_p1 = pnand %p324_p0, %p318_p11 }
  0x21   :  { %328 = shalt.err (!%p325_p1)
}
  0x22   :  { %22 = dma.hbm_to_vmem [thread:$0]  %s469_s0, 256, %s405_s15, [#allocation4], %s381_s24, %s381_s24, %s382_s25  }
  0x23   :  { %s383_s10 = smov [#allocation8]   ;;  %s329_s14 = scalar_lea.hbm %s471_s2, 16 }
  0x24   :  { %s41_s11 = sshll.u32 %s383_s10, 4  ;;  %p330_p2 = scmp.ne.s32.totalorder %s471_s2, %s329_s14  ;;  %s42_s11 = int_to_ptr.vmem [resolvable:$true] %s41_s11 }
  0x25   :  { %p333_p3 = scmp.lt.u32.totalorder %s329_s14, %s471_s2 }
  0x27   :  { %p335_p4 = pnand %p333_p3, %p330_p2 }
  0x29   :  { %338 = shalt.err (!%p335_p4)
}
  0x2a   :  { %s339_s20 = scalar_lea.vmem %s42_s11, 16  ;;  %s343_s0 = scalar_lea.vmem %s42_s11, 32 }
  0x2b   :  { %p340_p5 = scmp.ne.s32.totalorder %s42_s11, %s339_s20  ;;  %p344_p6 = scmp.lt.s32.totalorder %s42_s11, %s42_s11 }
  0x2c   :  { %p345_p7 = scmp.lt.s32.totalorder %s343_s0, %s339_s20 }
  0x2e   :  { %p346_p8 = por %p345_p7, %p344_p6 }
  0x30   :  { %p347_p9 = pnand %p346_p8, %p340_p5 }
  0x32   :  { %350 = shalt.err (!%p347_p9)
}
  0x33   :  { %44 = dma.hbm_to_vmem [thread:$0]  %s471_s2, 16, %s42_s11, [#allocation7]  }
  0x34   :  { %373 = dma.done.wait [#allocation4], 256  }
  0x35   :  { %374 = vsyncadd [#allocation4], 4294967040 }
  0x36   :  { %375 = dma.done.wait [#allocation7], 2064  }
  0x37   :  { %376 = vsyncadd [#allocation7], 4294965232  ;;  %v64_v0 = vld [vmem:[#allocation6] sm:$0xff]  ;;  %v65_v1 = vld [vmem:[#allocation6 + $0x8] sm:$0xff]  ;;  %s384_s2 = smov [#allocation9]  }
  0x38   :  { %v66_v2 = vld [vmem:[#allocation6 + $0x10] sm:$0xff]  ;;  %v247_v3 = vpack.c.bf16 %v65_v1, %v64_v0  ;;  %v67_v4 = vld [vmem:[#allocation6 + $0x18] sm:$0xff]  ;;  %v68_v6 = vld [vmem:[#allocation6 + $0x20] sm:$0xff]  ;;  %s180_s22 = sshll.u32 %s384_s2, 4  ;;  %s181_s22 = int_to_ptr.vmem [resolvable:$true] %s180_s22 }
  0x39   :  { %v251_v5 = vpack.c.bf16 %v67_v4, %v66_v2  ;;  %v69_v7 = vld [vmem:[#allocation6 + $0x28] sm:$0xff]  ;;  %v62_v9 = vld [vmem:[#allocation3] sm:$0xff]  ;;  %v71_v11 = vld [vmem:[#allocation6 + $0x38] sm:$0xff]  ;;  %s351_s23 = scalar_lea.vmem %s181_s22, 256  ;;  %p356_p11 = scmp.lt.s32.totalorder %s181_s22, %s181_s22 }
  0x3a   :  { %248 = vmatprep.subr.bf16.mxu0 %v247_v3  ;;  %v255_v8 = vpack.c.bf16 %v69_v7, %v68_v6  ;;  %v70_v10 = vld [vmem:[#allocation6 + $0x30] sm:$0xff]  ;;  %244 = vmatprep.mubr.f32.mxu0 %v62_v9  ;;  %v72_v13 = vld [vmem:[#allocation6 + $0x40] sm:$0xff]  ;;  %v73_v14 = vld [vmem:[#allocation6 + $0x48] sm:$0xff]  ;;  %p352_p10 = scmp.ne.s32.totalorder %s181_s22, %s351_s23  ;;  %p357_p12 = scmp.lt.s32.totalorder %s351_s23, %s351_s23 }
  0x3b   :  { %250 = vmatpush3.bf16.msra.mxu0 %v247_v3  ;;  %v259_v12 = vpack.c.bf16 %v71_v11, %v70_v10  ;;  %v263_v15 = vpack.c.bf16 %v73_v14, %v72_v13  ;;  %v74_v16 = vld [vmem:[#allocation6 + $0x50] sm:$0xff]  ;;  %v75_v17 = vld [vmem:[#allocation6 + $0x58] sm:$0xff]  ;;  %v76_v19 = vld [vmem:[#allocation6 + $0x60] sm:$0xff] }
  0x3c   :  { %252 = vmatprep.subr.bf16.mxu0 %v251_v5  ;;  %v267_v18 = vpack.c.bf16 %v75_v17, %v74_v16  ;;  %v77_v20 = vld [vmem:[#allocation6 + $0x68] sm:$0xff]  ;;  %v78_v22 = vld [vmem:[#allocation6 + $0x70] sm:$0xff]  ;;  %v79_v23 = vld [vmem:[#allocation6 + $0x78] sm:$0xff]  ;;  %p358_p13 = por %p357_p12, %p356_p11 }
  0x3d   :  { %v271_v21 = vpack.c.bf16 %v77_v20, %v76_v19  ;;  %v275_v24 = vpack.c.bf16 %v79_v23, %v78_v22  ;;  %v63_v25 = vld [vmem:[#allocation3 + $0x8] sm:$0xff]  ;;  %v193_v26 = vld [vmem:[#allocation8] ss:$0 sm:$0xff] }
  0x3e   :  { %p359_p0 = pnand %p358_p13, %p352_p10 }
  0x3f   :  { %254 = vmatpush3.bf16.msra.mxu0 %v251_v5 }
  0x40   :  { %256 = vmatprep.subr.bf16.mxu0 %v255_v8 }
  0x43   :  { %258 = vmatpush3.bf16.msra.mxu0 %v255_v8 }
  0x44   :  { %260 = vmatprep.subr.bf16.mxu0 %v259_v12 }
  0x47   :  { %262 = vmatpush3.bf16.msra.mxu0 %v259_v12 }
  0x48   :  { %264 = vmatprep.subr.bf16.mxu0 %v263_v15 }
  0x4b   :  { %266 = vmatpush3.bf16.msra.mxu0 %v263_v15 }
  0x4c   :  { %268 = vmatprep.subr.bf16.mxu0 %v267_v18 }
  0x4f   :  { %270 = vmatpush3.bf16.msra.mxu0 %v267_v18 }
  0x50   :  { %272 = vmatprep.subr.bf16.mxu0 %v271_v21 }
  0x53   :  { %274 = vmatpush3.bf16.msra.mxu0 %v271_v21 }
  0x54   :  { %276 = vmatprep.subr.bf16.mxu0 %v275_v24 }
  0x57   :  { %278 = vmatpush3.bf16.msra.mxu0 %v275_v24 }
  0x5a   :  { %245 = vmatmul.mubr.f32.vlgmr.msra.gmra.mrb[0].mxu0 %v63_v25 }
 0x12d   :  { %v246_v27 = vpop.f32.mrb[0].mxu0 }
 0x12e   :  { %v172_v28 = vadd.f32 %v246_v27, %v193_v26  ;;  %v146_v29 = vpop.f32.mrb[1].mxu0 }
 0x12f   :  { %v171_v30 = vadd.f32 %v193_v26, %v146_v29 }
 0x130   :  { %174 = vst [vmem:[#allocation9 + $0x8] sm:$0xff] %v172_v28 }
 0x131   :  { %173 = vst [vmem:[#allocation9] sm:$0xff] %v171_v30 }
 0x132   :  { %362 = shalt.err (!%p359_p0)
}
 0x133   :  { %s363_s28 = scalar_lea.hbm %s472_s3, 256 }
 0x134   :  { %p364_p1 = scmp.ne.s32.totalorder %s472_s3, %s363_s28  ;;  %p367_p2 = scmp.lt.u32.totalorder %s363_s28, %s472_s3 }
 0x136   :  { %p369_p3 = pnand %p367_p2, %p364_p1 }
 0x138   :  { %372 = shalt.err (!%p369_p3)
}
 0x139   :  { %186 = dma.vmem_to_hbm [thread:$0]  %s181_s22, 256, %s472_s3, [#allocation5], %s381_s24, %s381_s24, %s382_s25  }
 0x13a   :  { %377 = dma.done.wait [#allocation5], 256  }
 0x13b   :  { %378 = vsyncadd [#allocation5], 4294967040 }
 0x13c   :  { %190 = vsyncpa [#allocation4], 1 }
 0x13d   :  { %191 = vsyncpa [#allocation7], 1 }
 0x13e   :  { %192 = vsyncpa [#allocation5], 1 }

</bundles_post_ra>
